<compile_context>
chip_gen: v7x
topology: tpu7x:2x2x1
jax: 0.10.0
libtpu: 0.0.40
codegen_flags: <defaults>
</compile_context>

<pallas_src>
import functools

import jax
import jax.numpy as jnp
from jax import lax
from jax.experimental import pallas as pl
from jax.experimental.pallas import tpu as pltpu

EPS = 1e-9            # epsilon used by the PyTorch magnitude/phase split
EPS2 = EPS * EPS      # under the fused rsqrt: sqrt(sq + EPS^2) ~ sqrt(sq) + EPS


def _round_up(x, m):
    return ((x + m - 1) // m) * m


def _device_kind():
    try:
        return jax.devices()[0].device_kind.lower()
    except Exception:  # pragma: no cover - defensive
        return ""


def _vmem_limit_bytes(kind, fp, hp, tile_t, w_itemsize, weight_bufs, out_itemsize):
    """Generation-aware VMEM request computed from the actual footprint."""
    io_in = 2 * fp * tile_t * 4 * 2                 # planar input block, double buffered
    io_out = 2 * fp * tile_t * out_itemsize * 2     # planar output block, double buffered
    weights = weight_bufs * ((fp * hp + 4 * fp * hp) * w_itemsize + (hp + 4 * fp) * 4)
    interm = (hp + 12 * fp) * tile_t * 4            # h, fused y, elementwise temporaries
    est = io_in + io_out + weights + interm
    # v7x has only 64 MiB physical VMEM per TensorCore (and each TC holds its
    # own weight copy under megacore sharding); v5e/v6e have 128 MiB.
    cap = (48 << 20) if "v7" in kind else (100 << 20)
    return int(min(max(2 * est, 32 << 20), cap))


def _stft_net_kernel(x_ref, w1t_ref, b1t_ref, w2t_ref, b2t_ref, out_ref, *,
                     fp, matmul_dtype):
    # Native STFT layout: frequency on sublanes, time frames on lanes
    # (tile_t is a multiple of 128 -> every store is an unmasked full-lane vst).
    re = x_ref[0, 0]                                   # (Fp, tile_t) f32
    im = x_ref[1, 0]

    # _get_magnitude_cosine_sine(stft_representation), fused into one rsqrt:
    # sqrt + reciprocal -> single EUP op per element on the magnitude path.
    sq = re * re + im * im
    inv = lax.rsqrt(sq + EPS2)
    mag = sq * inv                                     # |x| (EPS-regularised)
    x_cos = re * inv
    x_sin = im * inv

    # Inner `model`: 2-layer MLP over frequency, written as transposed GEMMs so
    # the data never needs a transpose (contraction runs over sublanes):
    #   h^T = relu(W1^T @ mag^T + b1^T)                        (Hp, tile_t)
    #   y^T = [W2m | W2q | W2pre | W2pim]^T @ h^T + b2^T       (4*Fp, tile_t)
    # Hp is MXU-edge aligned (zero padded; relu(0)=0 keeps results identical).
    h = jnp.dot(w1t_ref[...], mag.astype(matmul_dtype),
                preferred_element_type=jnp.float32)
    h = jnp.maximum(h + b1t_ref[...], 0.0)             # (Hp, tile_t), f32

    # TODO(synk): if tile_t=512 plus a very large H ever bumps the v7x 64 MiB
    # budget, split this fused GEMM into two (2*Fp, Hp) halves to halve live y.
    y = jnp.dot(w2t_ref[...], h.astype(matmul_dtype),
                preferred_element_type=jnp.float32)
    y = y + b2t_ref[...]                                # fused bias, added once

    mask_logit = y[0 * fp:1 * fp]                       # each (Fp, tile_t) f32,
    q          = y[1 * fp:2 * fp]                       # sublane-aligned slices
    p_re       = y[2 * fp:3 * fp]
    p_im       = y[3 * fp:4 * fp]

    # bounding_function == sigmoid (default); tanh form = a single EUP op.
    bounded_mag_mask = 0.5 * (jnp.tanh(0.5 * mask_logit) + 1.0)

    # _get_magnitude_cosine_sine(P), same fused-rsqrt trick.
    p_sq = p_re * p_re + p_im * p_im
    p_inv = lax.rsqrt(p_sq + EPS2)
    m_cos = p_re * p_inv
    m_sin = p_im * p_inv

    # S_mag = relu(mask * spectrogram + Q); complex phase rotation.
    s_mag = jnp.maximum(bounded_mag_mask * mag + q, 0.0)
    phase_cos = x_cos * m_cos - x_sin * m_sin
    phase_sin = x_cos * m_sin + x_sin * m_cos

    out_ref[0, 0] = (s_mag * phase_cos).astype(out_ref.dtype)
    out_ref[1, 0] = (s_mag * phase_sin).astype(out_ref.dtype)


@functools.partial(jax.jit,
                   static_argnames=("tile_t", "matmul_dtype", "out_dtype",
                                    "planar_io"))
def decoupled_stft_prediction(stft, params, *, tile_t=None,
                              matmul_dtype=jnp.bfloat16,
                              out_dtype=jnp.float32,
                              planar_io=False):
    """stft: (B, Fbins, T, 2) f32 -> (B, Fbins, T, 2) out_dtype.

    With planar_io=True both sides use the planar (2, B, Fbins, T) layout and
    the wrapper does no layout passes at all (beyond optional padding).
    """
    if planar_io:
        two, B, Fbins, T = stft.shape
    else:
        B, Fbins, T, two = stft.shape
    assert two == 2
    H = params["w1"].shape[1]

    kind = _device_kind()
    # MXU edge: 128x128 on v5e, 256x256 on v6e/v7x.
    mxu_edge = 256 if ("v6" in kind or "v7" in kind) else 128
    # Grid-invariant weights only need one VMEM buffer; engage on v7x (64 MiB).
    weight_bufs = 1 if "v7" in kind else 2

    if tile_t is None:
        tile_t = 512   # 256->512 is the biggest measured mem-bound step; fits all gens.

    Fp = _round_up(Fbins, 8)    # sublane padding (bump to 16 if y slices ever go bf16)
    Tp = _round_up(T, 128)      # lane padding -> dense full-lane stores
    tile_t = max(128, (min(tile_t, Tp) // 128) * 128)
    if Tp % tile_t:
        Tp = _round_up(Tp, tile_t)
    Hp = _round_up(H, mxu_edge)  # MXU-aligned hidden dim (zero pad, bit-identical)

    mm_dt = jnp.dtype(matmul_dtype)
    out_dt = jnp.dtype(out_dtype)

    # Single planar (2, B, Fp, Tp) slab: at most one fused transpose+pad pass
    # (and none at all when planar_io=True with already-aligned shapes).
    x = stft if planar_io else jnp.moveaxis(stft, -1, 0)
    if Fp != Fbins or Tp != T:
        x = jnp.pad(x, ((0, 0), (0, 0), (0, Fp - Fbins), (0, Tp - T)))

    # Transposed / fused / MXU-aligned weights (cheap, once per call).
    w1t = jnp.pad(params["w1"], ((0, Fp - Fbins), (0, Hp - H))).T.astype(mm_dt)   # (Hp, Fp)
    b1t = jnp.pad(params["b1"], ((0, 0), (0, Hp - H))).reshape(-1, 1).astype(jnp.float32)  # (Hp, 1)
    w2_parts, b2_parts = [], []
    for name in ("mask", "q", "pre", "pim"):
        w2_parts.append(jnp.pad(params[f"w2_{name}"],
                                ((0, Hp - H), (0, Fp - Fbins))).T)                 # (Fp, Hp)
        b2_parts.append(jnp.pad(params[f"b2_{name}"], ((0, 0), (0, Fp - Fbins))).T)  # (Fp, 1)
    w2t = jnp.concatenate(w2_parts, axis=0).astype(mm_dt)            # (4*Fp, Hp)
    b2t = jnp.concatenate(b2_parts, axis=0).astype(jnp.float32)      # (4*Fp, 1)

    # Grid: (batch, time tiles); both axes parallel so the work shards across
    # the 2 TensorCores on v7x (each TC keeps its own copy of the weights;
    # that duplication is counted inside _vmem_limit_bytes).
    grid = (B, Tp // tile_t)
    data_in_spec = pl.BlockSpec((2, 1, Fp, tile_t), lambda b, t: (0, b, 0, t))
    data_out_spec = pl.BlockSpec((2, 1, Fp, tile_t), lambda b, t: (0, b, 0, t))

    def _weight_spec(shape):
        # Constant block index -> fetched once, VMEM-resident across the grid.
        if weight_bufs == 1:
            # v7x only: single-buffer the grid-invariant weights to free VMEM.
            return pl.BlockSpec(shape, lambda b, t: (0, 0),
                                pipeline_mode=pl.Buffered(1))
        return pl.BlockSpec(shape, lambda b, t: (0, 0))

    kernel = functools.partial(_stft_net_kernel, fp=Fp, matmul_dtype=mm_dt)

    out = pl.pallas_call(
        kernel,
        grid=grid,
        in_specs=[data_in_spec,
                  _weight_spec((Hp, Fp)),
                  _weight_spec((Hp, 1)),
                  _weight_spec((4 * Fp, Hp)),
                  _weight_spec((4 * Fp, 1))],
        out_specs=data_out_spec,
        out_shape=jax.ShapeDtypeStruct((2, B, Fp, Tp), out_dt),
        compiler_params=pltpu.CompilerParams(
            dimension_semantics=("parallel", "parallel"),
            vmem_limit_bytes=_vmem_limit_bytes(
                kind, Fp, Hp, tile_t, mm_dt.itemsize, weight_bufs,
                out_dt.itemsize),
        ),
    )(x, w1t, b1t, w2t, b2t)

    if Fp != Fbins or Tp != T:
        out = out[:, :, :Fbins, :T]
    if planar_io:
        return out
    # Back to the torch view_as_real layout (B, Fbins, T, 2) in one pass.
    return jnp.moveaxis(out, 0, -1)


def _reference(stft, params, matmul_dtype=jnp.float32):
    """Pure-JAX reference mirroring the PyTorch forward (only_pred_phases=False)."""
    re, im = stft[..., 0], stft[..., 1]
    mag = jnp.sqrt(re * re + im * im)
    x_cos = re / (mag + EPS)
    x_sin = im / (mag + EPS)

    B, Fbins, T = mag.shape
    x = jnp.transpose(mag, (0, 2, 1)).reshape(B * T, Fbins)

    def mm(a, w):
        return jnp.dot(a.astype(matmul_dtype), w.astype(matmul_dtype),
                       preferred_element_type=jnp.float32)

    h = jax.nn.relu(mm(x, params["w1"]) + params["b1"][0])
    mask_logit = mm(h, params["w2_mask"]) + params["b2_mask"][0]
    q = mm(h, params["w2_q"]) + params["b2_q"][0]
    p_re = mm(h, params["w2_pre"]) + params["b2_pre"][0]
    p_im = mm(h, params["w2_pim"]) + params["b2_pim"][0]

    def back(a):
        return jnp.transpose(a.reshape(B, T, Fbins), (0, 2, 1))

    mask_logit, q, p_re, p_im = map(back, (mask_logit, q, p_re, p_im))

    bounded = jax.nn.sigmoid(mask_logit)
    p_mag = jnp.sqrt(p_re * p_re + p_im * p_im)
    m_cos = p_re / (p_mag + EPS)
    m_sin = p_im / (p_mag + EPS)
    s_mag = jax.nn.relu(bounded * mag + q)
    phase_cos = x_cos * m_cos - x_sin * m_sin
    phase_sin = x_cos * m_sin + x_sin * m_cos
    return s_mag[..., None] * jnp.stack((phase_cos, phase_sin), axis=-1)


def _init_params(key, fbins, hidden):
    ks = jax.random.split(key, 10)
    scale1 = 1.0 / jnp.sqrt(fbins)
    scale2 = 1.0 / jnp.sqrt(hidden)
    return {
        "w1": jax.random.normal(ks[0], (fbins, hidden), jnp.float32) * scale1,
        "b1": jax.random.normal(ks[1], (1, hidden), jnp.float32) * 0.1,
        "w2_mask": jax.random.normal(ks[2], (hidden, fbins), jnp.float32) * scale2,
        "b2_mask": jax.random.normal(ks[3], (1, fbins), jnp.float32) * 0.1,
        "w2_q": jax.random.normal(ks[4], (hidden, fbins), jnp.float32) * scale2,
        "b2_q": jax.random.normal(ks[5], (1, fbins), jnp.float32) * 0.1,
        "w2_pre": jax.random.normal(ks[6], (hidden, fbins), jnp.float32) * scale2,
        "b2_pre": jax.random.normal(ks[7], (1, fbins), jnp.float32) * 0.1,
        "w2_pim": jax.random.normal(ks[8], (hidden, fbins), jnp.float32) * scale2,
        "b2_pim": jax.random.normal(ks[9], (1, fbins), jnp.float32) * 0.1,
    }


if __name__ == "__main__":
    B, FBINS, T, H = 2, 16, 8, 32
    key = jax.random.PRNGKey(0)
    k_x, k_p = jax.random.split(key)
    stft = jax.random.normal(k_x, (B, FBINS, T, 2), jnp.float32)
    params = _init_params(k_p, FBINS, H)

    out = decoupled_stft_prediction(stft, params)        # default bf16 MXU path
    out = jax.block_until_ready(out)
    assert out.shape == (B, FBINS, T, 2)

    # Compare against a dtype-matched reference (same bf16-rounded matmul
    # inputs, f32 accumulation), so the remaining differences are only MXU
    # accumulation order and the rsqrt/tanh formulation of the same math.
    ref = _reference(stft, params, matmul_dtype=jnp.bfloat16)
    max_diff = jnp.max(jnp.abs(out - ref))
    assert jnp.allclose(out, ref, atol=2e-2, rtol=2e-2), \
        f"max abs diff {max_diff}"

    # Zero-wrapper-copy planar I/O path must match the torch-layout path.
    planar_in = jnp.moveaxis(stft, -1, 0)
    out_planar = jax.block_until_ready(
        decoupled_stft_prediction(planar_in, params, planar_io=True))
    assert out_planar.shape == (2, B, FBINS, T)
    assert jnp.allclose(jnp.moveaxis(out_planar, 0, -1), out,
                        atol=1e-6, rtol=1e-6)

    print("KERNEL_OK")
</pallas_src>

<mosaic_0001>
module attributes {stable_mosaic.version = 11 : i64} {
  func.func @_stft_net_kernel(%arg0: i32, %arg1: i32, %arg2: memref<2x1x16x128xf32, #tpu.memory_space<vmem>>, %arg3: memref<128x16xbf16, #tpu.memory_space<vmem>>, %arg4: memref<128x1xf32, #tpu.memory_space<vmem>>, %arg5: memref<64x128xbf16, #tpu.memory_space<vmem>>, %arg6: memref<64x1xf32, #tpu.memory_space<vmem>>, %arg7: memref<2x1x16x128xf32, #tpu.memory_space<vmem>>) attributes {dimension_semantics = [#tpu.dimension_semantics<parallel>, #tpu.dimension_semantics<parallel>], iteration_bounds = array<i64: 2, 1>, scalar_prefetch = 0 : i64, scratch_operands = 0 : i64, tpu.core_type = #tpu.core_type<tc>, window_params = [{transform_indices = @transform_0, window_bounds = array<i64: 2, 1, 16, 128>}, {pipeline_mode = #tpu.pipeline_mode<synchronous>, transform_indices = @transform_1, window_bounds = array<i64: 128, 16>}, {pipeline_mode = #tpu.pipeline_mode<synchronous>, transform_indices = @transform_2, window_bounds = array<i64: 128, 1>}, {pipeline_mode = #tpu.pipeline_mode<synchronous>, transform_indices = @transform_3, window_bounds = array<i64: 64, 128>}, {pipeline_mode = #tpu.pipeline_mode<synchronous>, transform_indices = @transform_4, window_bounds = array<i64: 64, 1>}, {transform_indices = @transform_5, window_bounds = array<i64: 2, 1, 16, 128>}]} {
    %c0 = arith.constant 0 : index
    %c0_0 = arith.constant 0 : index
    %c0_1 = arith.constant 0 : index
    %c0_2 = arith.constant 0 : index
    %0 = vector.load %arg2[%c0, %c0_0, %c0_1, %c0_2] : memref<2x1x16x128xf32, #tpu.memory_space<vmem>>, vector<1x1x16x128xf32>
    %1 = vector.shape_cast %0 : vector<1x1x16x128xf32> to vector<16x128xf32>
    %c1 = arith.constant 1 : index
    %c0_3 = arith.constant 0 : index
    %c0_4 = arith.constant 0 : index
    %c0_5 = arith.constant 0 : index
    %2 = vector.load %arg2[%c1, %c0_3, %c0_4, %c0_5] : memref<2x1x16x128xf32, #tpu.memory_space<vmem>>, vector<1x1x16x128xf32>
    %3 = vector.shape_cast %2 : vector<1x1x16x128xf32> to vector<16x128xf32>
    %4 = arith.mulf %1, %1 : vector<16x128xf32>
    %5 = arith.mulf %3, %3 : vector<16x128xf32>
    %6 = arith.addf %4, %5 : vector<16x128xf32>
    %cst = arith.constant 1.000000e-18 : f32
    %7 = vector.broadcast %cst : f32 to vector<16x128xf32>
    %8 = arith.addf %6, %7 : vector<16x128xf32>
    %9 = math.rsqrt %8 : vector<16x128xf32>
    %10 = arith.mulf %6, %9 : vector<16x128xf32>
    %11 = arith.mulf %1, %9 : vector<16x128xf32>
    %12 = arith.mulf %3, %9 : vector<16x128xf32>
    %c0_6 = arith.constant 0 : index
    %c0_7 = arith.constant 0 : index
    %13 = vector.load %arg3[%c0_6, %c0_7] : memref<128x16xbf16, #tpu.memory_space<vmem>>, vector<128x16xbf16>
    %14 = arith.truncf %10 : vector<16x128xf32> to vector<16x128xbf16>
    %cst_8 = arith.constant dense<0.000000e+00> : vector<128x128xf32>
    %15 = tpu.matmul %13, %14, %cst_8 {dimension_numbers = #tpu.dot_dimension_numbers<[1], [0], [0], [1], [0, 0, 1, 1], [], []>} : vector<128x16xbf16>, vector<16x128xbf16>, vector<128x128xf32> -> vector<128x128xf32>
    %c0_9 = arith.constant 0 : index
    %c0_10 = arith.constant 0 : index
    %16 = vector.load %arg4[%c0_9, %c0_10] : memref<128x1xf32, #tpu.memory_space<vmem>>, vector<128x1xf32>
    %17 = vector.broadcast %16 : vector<128x1xf32> to vector<128x128xf32>
    %18 = arith.addf %15, %17 : vector<128x128xf32>
    %cst_11 = arith.constant 0.000000e+00 : f32
    %19 = vector.broadcast %cst_11 : f32 to vector<128x128xf32>
    %20 = arith.maximumf %18, %19 : vector<128x128xf32>
    %c0_12 = arith.constant 0 : index
    %c0_13 = arith.constant 0 : index
    %21 = vector.load %arg5[%c0_12, %c0_13] : memref<64x128xbf16, #tpu.memory_space<vmem>>, vector<64x128xbf16>
    %22 = arith.truncf %20 : vector<128x128xf32> to vector<128x128xbf16>
    %cst_14 = arith.constant dense<0.000000e+00> : vector<64x128xf32>
    %23 = tpu.matmul %21, %22, %cst_14 {dimension_numbers = #tpu.dot_dimension_numbers<[1], [0], [0], [1], [0, 0, 1, 1], [], []>} : vector<64x128xbf16>, vector<128x128xbf16>, vector<64x128xf32> -> vector<64x128xf32>
    %c0_15 = arith.constant 0 : index
    %c0_16 = arith.constant 0 : index
    %24 = vector.load %arg6[%c0_15, %c0_16] : memref<64x1xf32, #tpu.memory_space<vmem>>, vector<64x1xf32>
    %25 = vector.broadcast %24 : vector<64x1xf32> to vector<64x128xf32>
    %26 = arith.addf %23, %25 : vector<64x128xf32>
    %27 = vector.extract_strided_slice %26 {offsets = [0, 0], sizes = [16, 128], strides = [1, 1]} : vector<64x128xf32> to vector<16x128xf32>
    %28 = vector.extract_strided_slice %26 {offsets = [16, 0], sizes = [16, 128], strides = [1, 1]} : vector<64x128xf32> to vector<16x128xf32>
    %29 = vector.extract_strided_slice %26 {offsets = [32, 0], sizes = [16, 128], strides = [1, 1]} : vector<64x128xf32> to vector<16x128xf32>
    %30 = vector.extract_strided_slice %26 {offsets = [48, 0], sizes = [16, 128], strides = [1, 1]} : vector<64x128xf32> to vector<16x128xf32>
    %cst_17 = arith.constant 5.000000e-01 : f32
    %31 = vector.broadcast %cst_17 : f32 to vector<16x128xf32>
    %32 = arith.mulf %31, %27 : vector<16x128xf32>
    %33 = math.tanh %32 : vector<16x128xf32>
    %cst_18 = arith.constant 1.000000e+00 : f32
    %34 = vector.broadcast %cst_18 : f32 to vector<16x128xf32>
    %35 = arith.addf %33, %34 : vector<16x128xf32>
    %cst_19 = arith.constant 5.000000e-01 : f32
    %36 = vector.broadcast %cst_19 : f32 to vector<16x128xf32>
    %37 = arith.mulf %36, %35 : vector<16x128xf32>
    %38 = arith.mulf %29, %29 : vector<16x128xf32>
    %39 = arith.mulf %30, %30 : vector<16x128xf32>
    %40 = arith.addf %38, %39 : vector<16x128xf32>
    %cst_20 = arith.constant 1.000000e-18 : f32
    %41 = vector.broadcast %cst_20 : f32 to vector<16x128xf32>
    %42 = arith.addf %40, %41 : vector<16x128xf32>
    %43 = math.rsqrt %42 : vector<16x128xf32>
    %44 = arith.mulf %29, %43 : vector<16x128xf32>
    %45 = arith.mulf %30, %43 : vector<16x128xf32>
    %46 = arith.mulf %37, %10 : vector<16x128xf32>
    %47 = arith.addf %46, %28 : vector<16x128xf32>
    %cst_21 = arith.constant 0.000000e+00 : f32
    %48 = vector.broadcast %cst_21 : f32 to vector<16x128xf32>
    %49 = arith.maximumf %47, %48 : vector<16x128xf32>
    %50 = arith.mulf %11, %44 : vector<16x128xf32>
    %51 = arith.mulf %12, %45 : vector<16x128xf32>
    %52 = arith.subf %50, %51 : vector<16x128xf32>
    %53 = arith.mulf %11, %45 : vector<16x128xf32>
    %54 = arith.mulf %12, %44 : vector<16x128xf32>
    %55 = arith.addf %53, %54 : vector<16x128xf32>
    %56 = arith.mulf %49, %52 : vector<16x128xf32>
    %c0_22 = arith.constant 0 : index
    %c0_23 = arith.constant 0 : index
    %c0_24 = arith.constant 0 : index
    %c0_25 = arith.constant 0 : index
    %57 = vector.load %arg7[%c0_22, %c0_23, %c0_24, %c0_25] : memref<2x1x16x128xf32, #tpu.memory_space<vmem>>, vector<1x1x16x128xf32>
    %58 = vector.shape_cast %57 : vector<1x1x16x128xf32> to vector<16x128xf32>
    %59 = vector.shape_cast %56 : vector<16x128xf32> to vector<1x1x16x128xf32>
    tpu.vector_store %arg7[%c0_22, %c0_23, %c0_24, %c0_25], %59 {strides = array<i32>} : memref<2x1x16x128xf32, #tpu.memory_space<vmem>>, vector<1x1x16x128xf32>,
    %60 = arith.mulf %49, %55 : vector<16x128xf32>
    %c1_26 = arith.constant 1 : index
    %c0_27 = arith.constant 0 : index
    %c0_28 = arith.constant 0 : index
    %c0_29 = arith.constant 0 : index
    %61 = vector.load %arg7[%c1_26, %c0_27, %c0_28, %c0_29] : memref<2x1x16x128xf32, #tpu.memory_space<vmem>>, vector<1x1x16x128xf32>
    %62 = vector.shape_cast %61 : vector<1x1x16x128xf32> to vector<16x128xf32>
    %63 = vector.shape_cast %60 : vector<16x128xf32> to vector<1x1x16x128xf32>
    tpu.vector_store %arg7[%c1_26, %c0_27, %c0_28, %c0_29], %63 {strides = array<i32>} : memref<2x1x16x128xf32, #tpu.memory_space<vmem>>, vector<1x1x16x128xf32>,
    return
  }
  func.func @transform_0(%arg0: i32, %arg1: i32) -> (i32, i32, i32, i32) {
    %c0_i32 = arith.constant 0 : i32
    %c0_i32_0 = arith.constant 0 : i32
    %c0_i32_1 = arith.constant 0 : i32
    return %c0_i32, %arg0, %c0_i32_0, %arg1 : i32, i32, i32, i32
  }
  func.func @transform_1(%arg0: i32, %arg1: i32) -> (i32, i32) {
    %c0_i32 = arith.constant 0 : i32
    %c0_i32_0 = arith.constant 0 : i32
    %c0_i32_1 = arith.constant 0 : i32
    return %c0_i32, %c0_i32_0 : i32, i32
  }
  func.func @transform_2(%arg0: i32, %arg1: i32) -> (i32, i32) {
    %c0_i32 = arith.constant 0 : i32
    %c0_i32_0 = arith.constant 0 : i32
    %c0_i32_1 = arith.constant 0 : i32
    return %c0_i32, %c0_i32_0 : i32, i32
  }
  func.func @transform_3(%arg0: i32, %arg1: i32) -> (i32, i32) {
    %c0_i32 = arith.constant 0 : i32
    %c0_i32_0 = arith.constant 0 : i32
    %c0_i32_1 = arith.constant 0 : i32
    return %c0_i32, %c0_i32_0 : i32, i32
  }
  func.func @transform_4(%arg0: i32, %arg1: i32) -> (i32, i32) {
    %c0_i32 = arith.constant 0 : i32
    %c0_i32_0 = arith.constant 0 : i32
    %c0_i32_1 = arith.constant 0 : i32
    return %c0_i32, %c0_i32_0 : i32, i32
  }
  func.func @transform_5(%arg0: i32, %arg1: i32) -> (i32, i32, i32, i32) {
    %c0_i32 = arith.constant 0 : i32
    %c0_i32_0 = arith.constant 0 : i32
    %c0_i32_1 = arith.constant 0 : i32
    return %c0_i32, %arg0, %c0_i32_0, %arg1 : i32, i32, i32, i32
  }
}

</mosaic_0001>

<bundles_post_ra>
// kernel: decoupled_stft_prediction.1
= control target key start
LH: loop header
LB: loop body
LE: loop exit
PB: predicated region body
PF: predicated region fallthrough
CT: control target
= control target key end

     0   :  { %s1180_s18 = smov 0   ;;  %s1182_s19 = smov 0   ;;  %s1410_s0 = inlined_call_operand.vmem [shape: f32[2,2,16,128], index: 0, kind: input, shape index: {}]   ;;  %s1411_s1 = inlined_call_operand.vmem [shape: bf16[128,16], index: 1, kind: input, shape index: {}]   ;;  %s1412_s2 = inlined_call_operand.vmem [shape: f32[128,1], index: 2, kind: input, shape index: {}]   ;;  %s1413_s3 = inlined_call_operand.vmem [shape: bf16[64,128], index: 3, kind: input, shape index: {}]   ;;  %s1414_s4 = inlined_call_operand.vmem [shape: f32[64,1], index: 4, kind: input, shape index: {}]   ;;  %s1415_s5 = inlined_call_operand.vmem [shape: f32[2,2,16,128], index: 5, kind: output, shape index: {}]  }
   0x1   :  { %s1184_s20 = smov 0   ;;  %s1186_s21 = smov 0  }
   0x2   :  { %s1188_s22 = smov 0  }
   0x3 LB: > { %s27_s23 = sadd.s32 1, %s1143_s21  ;;  %s922_s24 = sadd.s32 4294967295, %s1147_s22   ;;  %s1147_s22 = sphi %s1188_s22, %s15_s22   ;;  %s1143_s21 = sphi %s1186_s21, %s1420_s21   ;;  %s1139_s20 = sphi %s1184_s20, %s1419_s20   ;;  %s1135_s19 = sphi %s1182_s19, %s1418_s19   ;;  %s1131_s18 = sphi %s1180_s18, %s1417_s18  }
   0x4   : > { %p29_p0 = scmp.ge.s32.totalorder %s27_s23, 2  ;;  %p43_p1 = scmp.ne.s32.totalorder %s1135_s19, %s1131_s18 }
   0x5   : > { %p44_p2 = scmp.eq.s32.totalorder %s1147_s22, 0  ;;  %p159_p4 = scmp.eq.s32.totalorder %s922_s24, 1 }
   0x6   : > { %s1422_s23 = smov (%p29_p0, %s27_s23), 0  ;;  %s36_s26 = sadd.s32 1, %s1135_s19 }
   0x7   : > { %p45_p3 = por %p44_p2, %p43_p1  ;;  %s31_s25 = ssub.s32 %s1143_s21, %s1422_s23 }
   0x8   : > { %p34_p5 = scmp.eq.s32.totalorder %s31_s25, 0  ;;  %p1215_p6 = por %p159_p4, %p43_p1 }
   0x9   : > { %p925_p7 = scmp.ge.s32.totalorder %s1147_s22, 2 }
   0xa   : > { %s1220_s28 = scalar_select %p34_p5, %s1135_s19, %s36_s26  }
   0xb   : > { %193 = sbr.rel (%p925_p7) target bundleno = 25 (0x19), region = 32 }
  0x12   : > { %196 = sbr.rel (!%p45_p3) target bundleno = 25 (0x19), region = 36  ;;  %s198_s29 = sand.u32 (%p45_p3), 1, %s1135_s19  }
  0x13   : > { %s961_s30 = sshll.u32 (%p45_p3), %s1143_s21, 4  ;;  %s926_s6 = sshll.u32 (%p45_p3), %s198_s29, 5 }
  0x14   : > { %s204_s9 = scalar_lea.vmem (%p45_p3), %s1410_s0, %s961_s30  ;;  %s200_s10 = scalar_lea.vmem (%p45_p3), [#allocation2], %s926_s6 }
  0x15   : > { %v238_v0 = vld [vmem:[%s204_s9] sm:$0xff] (%p45_p3)  ;;  %v240_v1 = vld [vmem:[%s204_s9 + $0x8] sm:$0xff] (%p45_p3) }
  0x16   : > { %v242_v2 = vld [vmem:[%s204_s9 + $0x20] sm:$0xff] (%p45_p3)  ;;  %239 = vst [vmem:[%s200_s10] sm:$0xff] (%p45_p3), %v238_v0  ;;  %241 = vst [vmem:[%s200_s10 + $0x8] sm:$0xff] (%p45_p3), %v240_v1  ;;  %v244_v3 = vld [vmem:[%s204_s9 + $0x28] sm:$0xff] (%p45_p3) }
  0x17   : > { %243 = vst [vmem:[%s200_s10 + $0x10] sm:$0xff] (%p45_p3), %v242_v2  ;;  %245 = vst [vmem:[%s200_s10 + $0x18] sm:$0xff] (%p45_p3), %v244_v3 }
  0x19 PF: > { %p929_p8 = scmp.ge.s32.totalorder %s1147_s22, 1  ;;  %p250_p9 = scmp.lt.s32.totalorder %s1147_s22, 3 }
  0x1b   : > { %p251_p10 = pnand %p929_p8, %p250_p9 }
  0x1c   : > { %s257_s11 = sand.u32 (!%p251_p10), 1, %s1131_s18   ;;  %v1085_v4 = vld [vmem:[%s1411_s1] sm:$0xff] (!%p251_p10)   ;;  %vm458_vm0 = vcmask (!%p251_p10), 130048   ;;  %v1149_v12 = vmov (!%p251_p10), 0   ;;  %v324_v19 = vld [vmem:[%s1412_s2 + $0x10] sm:$0xff] (!%p251_p10)  ;;  %v323_v20 = vld [vmem:[%s1412_s2 + $0x8] sm:$0xff] (!%p251_p10) }
  0x1d   : > { %254 = sbr.rel (%p251_p10) target bundleno = 564 (0x234), region = 74  ;;  %s1234_s14 = sshll.u32 (!%p251_p10), %s257_s11, 5  ;;  %986 = vmatprep.mubr.msk.bf16.mxu0 (!%p251_p10), %vm458_vm0, %v1085_v4  ;;  %1083 = vset.pattern.permute.xlu0 (!%p251_p10), %v1149_v12  ;;  %v322_v18 = vld [vmem:[%s1412_s2] sm:$0xff] (!%p251_p10)  ;;  %v325_v21 = vld [vmem:[%s1412_s2 + $0x18] sm:$0xff] (!%p251_p10)  ;;  %v327_v23 = vld [vmem:[%s1412_s2 + $0x28] sm:$0xff] (!%p251_p10) }
  0x1e   : > { %s259_s15 = scalar_lea.vmem (!%p251_p10), [#allocation2], %s1234_s14  ;;  %1084 = vset.pattern.permute.xlu1 (!%p251_p10), %v1149_v12  ;;  %340 = vperm.xlu0 (!%p251_p10), %1083, %v322_v18   ;;  %v326_v22 = vld [vmem:[%s1412_s2 + $0x20] sm:$0xff] (!%p251_p10)  ;;  %v328_v24 = vld [vmem:[%s1412_s2 + $0x30] sm:$0xff] (!%p251_p10)  ;;  %v329_v26 = vld [vmem:[%s1412_s2 + $0x38] sm:$0xff] (!%p251_p10)  ;;  %s282_s18 = scalar_lea.vmem (!%p251_p10), [#allocation3], %s1234_s14 }
  0x1f   : > { %v1238_v5 = vld [vmem:[%s259_s15] sm:$0xff] (!%p251_p10)  ;;  %v1240_v6 = vld [vmem:[%s259_s15 + $0x8] sm:$0xff] (!%p251_p10)  ;;  %v1242_v7 = vld [vmem:[%s259_s15 + $0x10] sm:$0xff] (!%p251_p10)  ;;  %350 = vperm.xlu1 (!%p251_p10), %1084, %v324_v19  }
  0x20   : > { %v1244_v8 = vld [vmem:[%s259_s15 + $0x18] sm:$0xff] (!%p251_p10)  ;;  %v289_v9 = vmul.f32 (!%p251_p10), %v1238_v5, %v1238_v5  ;;  %v290_v10 = vmul.f32 (!%p251_p10), %v1240_v6, %v1240_v6  ;;  %v291_v11 = vmul.f32 (!%p251_p10), %v1242_v7, %v1242_v7  ;;  %v330_v31 = vld [vmem:[%s1412_s2 + $0x40] sm:$0xff] (!%p251_p10)  ;;  %v331_v32 = vld [vmem:[%s1412_s2 + $0x48] sm:$0xff] (!%p251_p10) }
  0x21   : > { %v292_v13 = vmul.f32 (!%p251_p10), %v1244_v8, %v1244_v8  ;;  %v1086_v33 = vld [vmem:[%s1411_s1 + $0x8] sm:$0xff] (!%p251_p10)   ;;  %v1087_v34 = vld [vmem:[%s1411_s1 + $0x10] sm:$0xff] (!%p251_p10)   ;;  %v333_v36 = vld [vmem:[%s1412_s2 + $0x58] sm:$0xff] (!%p251_p10) }
  0x22   : > { %v293_v14 = vadd.f32 (!%p251_p10), %v291_v11, %v289_v9  ;;  %345 = vperm.xlu0 (!%p251_p10), %1083, %v323_v20   ;;  %v332_v35 = vld [vmem:[%s1412_s2 + $0x50] sm:$0xff] (!%p251_p10)  ;;  %v334_v37 = vld [vmem:[%s1412_s2 + $0x60] sm:$0xff] (!%p251_p10)  ;;  %v335_v38 = vld [vmem:[%s1412_s2 + $0x68] sm:$0xff] (!%p251_p10) }
  0x23   : > { %v294_v15 = vadd.f32 (!%p251_p10), %v292_v13, %v290_v10  ;;  %355 = vperm.xlu1 (!%p251_p10), %1084, %v325_v21   ;;  %v1088_v39 = vld [vmem:[%s1411_s1 + $0x18] sm:$0xff] (!%p251_p10)   ;;  %v1089_v40 = vld [vmem:[%s1411_s1 + $0x20] sm:$0xff] (!%p251_p10)   ;;  %v336_v41 = vld [vmem:[%s1412_s2 + $0x70] sm:$0xff] (!%p251_p10) }
  0x24   : > { %v295_v16 = vadd.f32 1e-18, %v293_v14  ;;  %v337_v42 = vld [vmem:[%s1412_s2 + $0x78] sm:$0xff]  ;;  %v612_v43 = vld [vmem:[%s1414_s4] sm:$0xff]  ;;  %v613_v44 = vld [vmem:[%s1414_s4 + $0x8] sm:$0xff]  ;;  %s962_s24 = sshll.u32 (%p1215_p6), %s1139_s20, 4 }
  0x25   : > { %v296_v17 = vadd.f32 1e-18, %v294_v15  ;;  %v1090_v45 = vld [vmem:[%s1411_s1 + $0x28] sm:$0xff]   ;;  %v1091_v46 = vld [vmem:[%s1411_s1 + $0x30] sm:$0xff]   ;;  %v616_v47 = vld [vmem:[%s1414_s4 + $0x20] sm:$0xff]  ;;  %s808_s29 = scalar_lea.vmem (%p1215_p6), %s1415_s5, %s962_s24 }
  0x26   : > { %1097 = vrsqrt.f32 %v295_v16  ;;  %360 = vperm.xlu0 %1083, %v326_v22   ;;  %v617_v48 = vld [vmem:[%s1414_s4 + $0x28] sm:$0xff]  ;;  %v618_v49 = vld [vmem:[%s1414_s4 + $0x30] sm:$0xff]  ;;  %v619_v50 = vld [vmem:[%s1414_s4 + $0x38] sm:$0xff] }
  0x27   : > { %1099 = vrsqrt.f32 %v296_v17  ;;  %365 = vperm.xlu1 %1084, %v327_v23   ;;  %v1092_v51 = vld [vmem:[%s1411_s1 + $0x38] sm:$0xff]   ;;  %v614_v52 = vld [vmem:[%s1414_s4 + $0x10] sm:$0xff]  ;;  %v1093_v54 = vld [vmem:[%s1413_s3] sm:$0xff]  }
  0x28   : > { %v615_v53 = vld [vmem:[%s1414_s4 + $0x18] sm:$0xff]  ;;  %v1094_v55 = vld [vmem:[%s1413_s3 + $0x10] sm:$0xff]  }
  0x29   : > { %1022 = vmatprep.mubr.bf16.mxu1 %v1094_v55 }
  0x2a   : > { %370 = vperm.xlu0 %1083, %v328_v24  }
  0x2b   : > { %375 = vperm.xlu1 %1084, %v329_v26  }
  0x2e   : > { %380 = vperm.xlu0 %1083, %v330_v31  }
  0x2f   : > { %385 = vperm.xlu1 %1084, %v331_v32  }
  0x30   : > { %v1275_v25 = vpop.eup %1097 }
  0x31   : > { %v1280_v27 = vpop.eup %1099  ;;  %v1283_v28 = vmul.f32 %v1275_v25, %v293_v14 }
  0x32   : > { %v1286_v29 = vmul.f32 %v1280_v27, %v294_v15  ;;  %390 = vperm.xlu0 %1083, %v332_v35  }
  0x33   : > { %395 = vperm.xlu1 %1084, %v333_v36  }
  0x34   : > { %v321_v30 = vpack.c.bf16 %v1286_v29, %v1283_v28 }
  0x36   : > { %984 = vmatprep.subr.bf16.mxu0 %v321_v30  ;;  %400 = vperm.xlu0 %1083, %v334_v37  }
  0x37   : > { %985 = vmatpush3.bf16.msra.mxu0 %v321_v30  ;;  %405 = vperm.xlu1 %1084, %v335_v38  }
  0x3a   : > { %987 = vmatmul.mubr.msk.bf16.vlgmr.msra.gmra.mrb[0].mxu0 %vm458_vm0, %v1086_v33  ;;  %410 = vperm.xlu0 %1083, %v336_v41  }
  0x3b   : > { %990 = vmatprep.mubr.msk.bf16.mxu0 %vm458_vm0, %v1087_v34  ;;  %415 = vperm.xlu1 %1084, %v337_v42  }
  0x3e   : > { %622 = vperm.xlu0 %1083, %v612_v43  }
  0x3f   : > { %627 = vperm.xlu1 %1084, %v613_v44  }
  0x42   : > { %991 = vmatmul.mubr.msk.bf16.gmra.mrb[4].mxu0 %vm458_vm0, %v1088_v39  ;;  %642 = vperm.xlu0 %1083, %v616_v47  }
  0x43   : > { %994 = vmatprep.mubr.msk.bf16.mxu0 %vm458_vm0, %v1089_v40  ;;  %647 = vperm.xlu1 %1084, %v617_v48  }
  0x46   : > { %652 = vperm.xlu0 %1083, %v618_v49  }
  0x47   : > { %657 = vperm.xlu1 %1084, %v619_v50  }
  0x4a   : > { %995 = vmatmul.mubr.msk.bf16.gmra.mrb[8].mxu0 %vm458_vm0, %v1090_v45  ;;  %632 = vperm.xlu0 %1083, %v614_v52  }
  0x4b   : > { %998 = vmatprep.mubr.msk.bf16.mxu0 %vm458_vm0, %v1091_v46  ;;  %637 = vperm.xlu1 %1084, %v615_v53  }
  0x52   : > { %999 = vmatmul.mubr.msk.bf16.gmra.mrb[12].mxu0 %vm458_vm0, %v1092_v51 }
  0x53   : > { %1018 = vmatprep.mubr.bf16.mxu0 %v1093_v54 }
  0x9d   : > { %v341_v56 = vpop.permute.xlu0 %340 }
  0x9e   : > { %v351_v57 = vpop.permute.xlu1 %350 }
  0xa1   : > { %v346_v58 = vpop.permute.xlu0 %345 }
  0xa2   : > { %v356_v59 = vpop.permute.xlu1 %355 }
  0xa5   : > { %v361_v60 = vpop.permute.xlu0 %360 }
  0xa6   : > { %v366_v61 = vpop.permute.xlu1 %365 }
  0xa9   : > { %v371_v62 = vpop.permute.xlu0 %370 }
  0xaa   : > { %v376_v2 = vpop.permute.xlu1 %375 }
  0xad   : > { %v381_v14 = vpop.permute.xlu0 %380 }
  0xae   : > { %v386_v18 = vpop.permute.xlu1 %385 }
  0xb1   : > { %v391_v31 = vpop.permute.xlu0 %390 }
  0xb2   : > { %v396_v35 = vpop.permute.xlu1 %395 }
  0xb5   : > { %v401_v43 = vpop.permute.xlu0 %400 }
  0xb6   : > { %v406_v48 = vpop.permute.xlu1 %405 }
  0xb9   : > { %v411_v55 = vpop.permute.xlu0 %410 }
 0x10d   : > { %v988_v63 = vpop.f32.mrb[0].mxu0 }
 0x10e   : > { %v526_v0 = vadd.f32 %v988_v63, %v351_v57  ;;  %v517_v1 = vpop.f32.mrb[1].mxu0 }
 0x10f   : > { %v518_v3 = vadd.f32 %v517_v1, %v341_v56  ;;  %v989_v4 = vpop.f32.mrb[2].mxu0 }
 0x110   : > { %v529_v9 = vadd.f32 %v989_v4, %v356_v59  ;;  %v520_v10 = vpop.f32.mrb[3].mxu0  ;;  %v582_v12 = vmax.f32 %v526_v0, 0.0 }
 0x111   : > { %v521_v11 = vadd.f32 %v520_v10, %v346_v58  ;;  %v580_v15 = vmax.f32 %v518_v3, 0.0 }
 0x112   : > { %v583_v13 = vmax.f32 %v529_v9, 0.0 }
 0x113   : > { %v581_v16 = vmax.f32 %v521_v11, 0.0 }
 0x114   : > { %v605_v17 = vpack.c.bf16 %v583_v13, %v582_v12  ;;  %v1095_v12 = vld [vmem:[%s1413_s3 + $0x8] sm:$0xff]   ;;  %v1096_v13 = vld [vmem:[%s1413_s3 + $0x18] sm:$0xff]  }
 0x115   : > { %v604_v19 = vpack.c.bf16 %v581_v16, %v580_v15  ;;  %v992_v20 = vpop.f32.mrb[4].mxu0 }
 0x116   : > { %v542_v21 = vadd.f32 %v992_v20, %v371_v62  ;;  %v533_v22 = vpop.f32.mrb[5].mxu0 }
 0x117   : > { %v534_v23 = vadd.f32 %v533_v22, %v361_v60  ;;  %v993_v24 = vpop.f32.mrb[6].mxu0  ;;  %1002 = vmatprep.subr.bf16.mxu0 %v604_v19  ;;  %1026 = vmatprep.subr.bf16.mxu1 %v604_v19  ;;  %v416_v60 = vpop.permute.xlu1 %415 }
 0x118   : > { %v545_v26 = vadd.f32 %v993_v24, %v376_v2  ;;  %v536_v30 = vpop.f32.mrb[7].mxu0  ;;  %1003 = vmatpush3.bf16.msra.mxu0 %v604_v19  ;;  %1034 = vmatpush3.bf16.msra.mxu1 %v604_v19  ;;  %v586_v33 = vmax.f32 %v542_v21, 0.0 }
 0x119   : > { %v537_v32 = vadd.f32 %v536_v30, %v366_v61  ;;  %1004 = vmatprep.subr.bf16.mxu0 %v605_v17  ;;  %1027 = vmatprep.subr.bf16.mxu1 %v605_v17  ;;  %v584_v36 = vmax.f32 %v534_v23, 0.0 }
 0x11a   : > { %v587_v34 = vmax.f32 %v545_v26, 0.0 }
 0x11b   : > { %v585_v37 = vmax.f32 %v537_v32, 0.0  ;;  %v628_v15 = vpop.permute.xlu1 %627 }
 0x11c   : > { %v607_v38 = vpack.c.bf16 %v587_v34, %v586_v33  ;;  %1005 = vmatpush3.bf16.msra.mxu0 %v605_v17  ;;  %1035 = vmatpush3.bf16.msra.mxu1 %v605_v17 }
 0x11d   : > { %v606_v39 = vpack.c.bf16 %v585_v37, %v584_v36  ;;  %v996_v40 = vpop.f32.mrb[8].mxu0 }
 0x11e   : > { %v558_v41 = vadd.f32 %v996_v40, %v391_v31  ;;  %v549_v42 = vpop.f32.mrb[9].mxu0 }
 0x11f   : > { %v550_v44 = vadd.f32 %v549_v42, %v381_v14  ;;  %v997_v45 = vpop.f32.mrb[10].mxu0  ;;  %1006 = vmatprep.subr.bf16.mxu0 %v606_v39  ;;  %1028 = vmatprep.subr.bf16.mxu1 %v606_v39  ;;  %v623_v14 = vpop.permute.xlu0 %622 }
 0x120   : > { %v561_v46 = vadd.f32 %v997_v45, %v396_v35  ;;  %v552_v47 = vpop.f32.mrb[11].mxu0  ;;  %1007 = vmatpush3.bf16.msra.mxu0 %v606_v39  ;;  %1036 = vmatpush3.bf16.msra.mxu1 %v606_v39  ;;  %v590_v50 = vmax.f32 %v558_v41, 0.0  ;;  %v648_v17 = vpop.permute.xlu1 %647 }
 0x121   : > { %v553_v49 = vadd.f32 %v552_v47, %v386_v18  ;;  %1008 = vmatprep.subr.bf16.mxu0 %v607_v38  ;;  %1029 = vmatprep.subr.bf16.mxu1 %v607_v38  ;;  %v588_v52 = vmax.f32 %v550_v44, 0.0 }
 0x122   : > { %v591_v51 = vmax.f32 %v561_v46, 0.0 }
 0x123   : > { %v589_v53 = vmax.f32 %v553_v49, 0.0  ;;  %v643_v16 = vpop.permute.xlu0 %642 }
 0x124   : > { %v609_v54 = vpack.c.bf16 %v591_v51, %v590_v50  ;;  %1009 = vmatpush3.bf16.msra.mxu0 %v607_v38  ;;  %1037 = vmatpush3.bf16.msra.mxu1 %v607_v38  ;;  %v658_v19 = vpop.permute.xlu1 %657 }
 0x125   : > { %v608_v56 = vpack.c.bf16 %v589_v53, %v588_v52  ;;  %v1000_v57 = vpop.f32.mrb[12].mxu0  ;;  %v301_v53 = vmul.f32 %v1275_v25, %v1238_v5  ;;  %v304_v5 = vmul.f32 %v1280_v27, %v1244_v8 }
 0x126   : > { %v574_v58 = vadd.f32 %v1000_v57, %v411_v55  ;;  %v565_v59 = vpop.f32.mrb[13].mxu0 }
 0x127   : > { %v566_v61 = vadd.f32 %v565_v59, %v401_v43  ;;  %v1001_v62 = vpop.f32.mrb[14].mxu0  ;;  %1010 = vmatprep.subr.bf16.mxu0 %v608_v56  ;;  %1030 = vmatprep.subr.bf16.mxu1 %v608_v56  ;;  %v653_v18 = vpop.permute.xlu0 %652 }
 0x128   : > { %v577_v63 = vadd.f32 %v1001_v62, %v416_v60  ;;  %v568_v0 = vpop.f32.mrb[15].mxu0  ;;  %1011 = vmatpush3.bf16.msra.mxu0 %v608_v56  ;;  %1038 = vmatpush3.bf16.msra.mxu1 %v608_v56  ;;  %v594_v2 = vmax.f32 %v574_v58, 0.0  ;;  %v638_v58 = vpop.permute.xlu1 %637 }
 0x129   : > { %v569_v1 = vadd.f32 %v568_v0, %v406_v48  ;;  %1012 = vmatprep.subr.bf16.mxu0 %v609_v54  ;;  %1031 = vmatprep.subr.bf16.mxu1 %v609_v54  ;;  %v592_v4 = vmax.f32 %v566_v61, 0.0 }
 0x12a   : > { %v595_v3 = vmax.f32 %v577_v63, 0.0 }
 0x12b   : > { %v593_v9 = vmax.f32 %v569_v1, 0.0  ;;  %v633_v51 = vpop.permute.xlu0 %632  ;;  %v302_v1 = vmul.f32 %v1280_v27, %v1240_v6 }
 0x12c   : > { %v611_v10 = vpack.c.bf16 %v595_v3, %v594_v2  ;;  %1013 = vmatpush3.bf16.msra.mxu0 %v609_v54  ;;  %1039 = vmatpush3.bf16.msra.mxu1 %v609_v54  ;;  %v303_v54 = vmul.f32 %v1275_v25, %v1242_v7 }
 0x12d   : > { %v610_v11 = vpack.c.bf16 %v593_v9, %v592_v4 }
 0x12f   : > { %1014 = vmatprep.subr.bf16.mxu0 %v610_v11  ;;  %1032 = vmatprep.subr.bf16.mxu1 %v610_v11 }
 0x130   : > { %1015 = vmatpush3.bf16.msra.mxu0 %v610_v11  ;;  %1040 = vmatpush3.bf16.msra.mxu1 %v610_v11 }
 0x131   : > { %1016 = vmatprep.subr.bf16.mxu0 %v611_v10  ;;  %1033 = vmatprep.subr.bf16.mxu1 %v611_v10 }
 0x134   : > { %1017 = vmatpush3.bf16.msra.mxu0 %v611_v10  ;;  %1041 = vmatpush3.bf16.msra.mxu1 %v611_v10 }
 0x137   : > { %1019 = vmatmul.mubr.bf16.vlgmr.msra.gmra.mrb[16].mxu0 %v1095_v12  ;;  %1023 = vmatmul.mubr.bf16.vlgmr.msra.gmra.mrb[0].mxu1 %v1096_v13 }
 0x20a   : > { %v1020_v20 = vpop.f32.mrb[16].mxu0  ;;  %v1024_v21 = vpop.f32.mrb[0].mxu1 }
 0x20b   : > { %v743_v22 = vadd.f32 %v1024_v21, %v653_v18  ;;  %v718_v23 = vpop.f32.mrb[17].mxu0  ;;  %v734_v24 = vpop.f32.mrb[1].mxu1  ;;  %v727_v57 = vadd.f32 %v1020_v20, %v633_v51 }
 0x20c   : > { %v719_v26 = vadd.f32 %v718_v23, %v623_v14  ;;  %v735_v30 = vadd.f32 %v734_v24, %v643_v16  ;;  %v1021_v31 = vpop.f32.mrb[18].mxu0  ;;  %v1025_v32 = vpop.f32.mrb[2].mxu1 }
 0x20d   : > { %v759_v33 = vmul.f32 %v743_v22, %v743_v22  ;;  %v746_v34 = vadd.f32 %v1025_v32, %v658_v19  ;;  %v721_v35 = vpop.f32.mrb[19].mxu0  ;;  %v737_v36 = vpop.f32.mrb[3].mxu1  ;;  %v730_v0 = vadd.f32 %v1021_v31, %v638_v58 }
 0x20e   : > { %v749_v37 = vmul.f32 0.5, %v719_v26  ;;  %v757_v38 = vmul.f32 %v735_v30, %v735_v30  ;;  %v722_v39 = vadd.f32 %v721_v35, %v628_v15  ;;  %v738_v40 = vadd.f32 %v737_v36, %v648_v17 }
 0x20f   : > { %v760_v41 = vmul.f32 %v746_v34, %v746_v34 }
 0x210   : > { %1101 = vtanh.f32 %v749_v37  ;;  %v761_v42 = vadd.f32 %v759_v33, %v757_v38  ;;  %v750_v43 = vmul.f32 0.5, %v722_v39  ;;  %v758_v44 = vmul.f32 %v738_v40, %v738_v40 }
 0x212   : > { %v763_v45 = vadd.f32 1e-18, %v761_v42  ;;  %1103 = vtanh.f32 %v750_v43  ;;  %v762_v46 = vadd.f32 %v760_v41, %v758_v44 }
 0x214   : > { %1105 = vrsqrt.f32 %v763_v45  ;;  %v764_v47 = vadd.f32 1e-18, %v762_v46 }
 0x216   : > { %1107 = vrsqrt.f32 %v764_v47 }
 0x21a   : > { %v1102_v48 = vpop.eup %1101 }
 0x21b   : > { %v753_v49 = vadd.f32 1.0, %v1102_v48 }
 0x21c   : > { %v1104_v50 = vpop.eup %1103 }
 0x21d   : > { %v755_v52 = vmul.f32 0.5, %v753_v49  ;;  %v754_v55 = vadd.f32 1.0, %v1104_v50 }
 0x21e   : > { %v1106_v56 = vpop.eup %1105 }
 0x21f   : > { %v771_v59 = vmul.f32 %v755_v52, %v1283_v28  ;;  %v767_v60 = vmul.f32 %v1106_v56, %v735_v30  ;;  %v769_v61 = vmul.f32 %v1106_v56, %v743_v22  ;;  %v756_v62 = vmul.f32 0.5, %v754_v55 }
 0x220   : > { %v1108_v63 = vpop.eup %1107 }
 0x221   : > { %v773_v2 = vadd.f32 %v771_v59, %v727_v57  ;;  %v777_v3 = vmul.f32 %v767_v60, %v301_v53  ;;  %v779_v7 = vmul.f32 %v769_v61, %v303_v54  ;;  %v783_v25 = vmul.f32 %v769_v61, %v301_v53 }
 0x222   : > { %v785_v4 = vmul.f32 %v767_v60, %v303_v54  ;;  %v772_v9 = vmul.f32 %v756_v62, %v1286_v29  ;;  %v768_v28 = vmul.f32 %v1108_v63, %v738_v40  ;;  %v770_v10 = vmul.f32 %v1108_v63, %v746_v34 }
 0x223   : > { %v775_v11 = vmax.f32 %v773_v2, 0.0  ;;  %v781_v12 = vsub.f32 %v777_v3, %v779_v7 }
 0x224   : > { %v787_v13 = vadd.f32 %v785_v4, %v783_v25  ;;  %v774_v14 = vadd.f32 %v772_v9, %v730_v0  ;;  %v778_v15 = vmul.f32 %v768_v28, %v302_v1  ;;  %v780_v16 = vmul.f32 %v770_v10, %v304_v5 }
 0x225   : > { %v789_v6 = vmul.f32 %v781_v12, %v775_v11  ;;  %v784_v17 = vmul.f32 %v770_v10, %v302_v1  ;;  %v786_v18 = vmul.f32 %v768_v28, %v304_v5  ;;  %804 = sbr.rel (!%p1215_p6) target bundleno = 564 (0x234), region = 82 }
 0x226   : > { %v793_v8 = vmul.f32 %v787_v13, %v775_v11  ;;  %v776_v27 = vmax.f32 %v774_v14, 0.0  ;;  %v782_v19 = vsub.f32 %v778_v15, %v780_v16 }
 0x227   : > { %791 = vst [vmem:[%s282_s18] sm:$0xff] %v789_v6  ;;  %v788_v20 = vadd.f32 %v786_v18, %v784_v17 }
 0x228   : > { %954 = vst [vmem:[%s282_s18 + $0x10] sm:$0xff] %v793_v8  ;;  %v790_v21 = vmul.f32 %v782_v19, %v776_v27 }
 0x229   : > { %v794_v29 = vmul.f32 %v788_v20, %v776_v27 }
 0x22a   : > { %792 = vst [vmem:[%s282_s18 + $0x8] sm:$0xff] %v790_v21 }
 0x22b   : > { %955 = vst [vmem:[%s282_s18 + $0x18] sm:$0xff] %v794_v29 }
 0x22e   : > { %v842_v22 = vld [vmem:[%s282_s18] sm:$0xff] }
 0x22f   : > { %v846_v24 = vld [vmem:[%s282_s18 + $0x10] sm:$0xff]  ;;  %843 = vst [vmem:[%s808_s29] sm:$0xff] %v842_v22 }
 0x230   : > { %847 = vst [vmem:[%s808_s29 + $0x20] sm:$0xff] %v846_v24 }
 0x231   : > { %v844_v23 = vld [vmem:[%s282_s18 + $0x8] sm:$0xff] }
 0x232   : > { %v848_v26 = vld [vmem:[%s282_s18 + $0x18] sm:$0xff]  ;;  %845 = vst [vmem:[%s808_s29 + $0x8] sm:$0xff] %v844_v23 }
 0x233   : > { %849 = vst [vmem:[%s808_s29 + $0x28] sm:$0xff] %v848_v26 }
 0x234 PF: > { %s15_s22 = sadd.s32 1, %s1147_s22   ;;  %s1417_s18 = smov %s1135_s19 }
 0x235   : > { %p12_p11 = scmp.ge.s32.totalorder %s15_s22, 4   ;;  %s1418_s19 = smov %s1220_s28 }
 0x236   : > { %s1419_s20 = smov %s1143_s21  ;;  %s1420_s21 = smov %s1422_s23 }
 0x237   :  { %14 = sbr.rel (!%p12_p11) target bundleno = 3 (0x3), region = 153 }

</bundles_post_ra>
